<compile_context>
chip_gen: v7x
topology: tpu7x:2x2x1
jax: 0.10.0
libtpu: 0.0.40
codegen_flags: <defaults>
</compile_context>

<pallas_src>
import jax
import jax.numpy as jnp
from jax.experimental import pallas as pl
from jax.experimental.pallas import tpu as pltpu

LANE = 128   # lane width: last-dim granule
SUB = 8      # sublane granule for row tiles


def _round_up(n, m):
    return ((n + m - 1) // m) * m


def ffn_kernel(x_ref, w1_ref, b1_ref, w2_ref, b2_ref, o_ref, acc_ref):
    j = pl.program_id(1)

    @pl.when(j == 0)
    def _init():
        acc_ref[...] = jnp.zeros_like(acc_ref)

    # Cast X to the MXU compute dtype in-kernel (X is DMA'd once per row tile
    # and stays VMEM-resident across hidden chunks; the cast is cheap VPU work
    # hidden under the MXU).
    x = x_ref[...].astype(w1_ref.dtype)
    # dense1 chunk: [TM, d_in] @ [d_in, TH] on the MXU, f32 accumulation.
    h = jnp.dot(x, w1_ref[...], preferred_element_type=jnp.float32)
    # bias (f32) + ReLU on the VPU, then cast to the weight dtype so the
    # second matmul also runs at compute-dtype MXU peak (no-op for f32).
    h = jnp.maximum(h + b1_ref[...], 0.0).astype(w2_ref.dtype)
    # dense2 partial sum: [TM, TH] @ [TH, d_out_p], accumulated in f32 scratch.
    acc_ref[...] += jnp.dot(h, w2_ref[...], preferred_element_type=jnp.float32)

    @pl.when(j == pl.num_programs(1) - 1)
    def _finalize():
        o_ref[...] = (acc_ref[...] + b2_ref[...]).astype(o_ref.dtype)


def _vmem_budget_bytes():
    """Per-generation VMEM budget: capacity minus scoped headroom."""
    try:
        cap = int(pltpu.get_tpu_info().vmem_capacity_bytes)
    except Exception:
        cap = 64 * 1024 * 1024  # conservative fallback (works on all gens)
    # ~112 MiB on v5e/v6e (128 MiB VMEM), ~48 MiB on v7x (64 MiB VMEM).
    return max(cap - 16 * 1024 * 1024, (cap * 3) // 4)


def _choose_tiles(m, d_in, d_hidden_p, d_out_p, xbytes, obytes, cbytes,
                  block_rows, vmem_budget):
    # Hidden-chunk width: largest of (512, 256, 128) that divides d_hidden_p
    # (d_hidden_p is always a multiple of 128, so this always terminates).
    th = next(t for t in (512, 256, 128) if d_hidden_p % t == 0)

    def vmem_needed(tm):
        return (
            2 * tm * d_in * xbytes          # double-buffered X row tiles
            + 2 * tm * d_out_p * obytes     # double-buffered output tiles
            + tm * d_out_p * 4              # f32 accumulator scratch
            + 2 * d_in * th * cbytes        # double-buffered w1 chunks
            + 2 * th * d_out_p * cbytes     # double-buffered w2 chunks
            + 2 * SUB * th * 4              # b1 chunks (f32, sublane-padded)
            + 2 * SUB * d_out_p * 4         # b2 (f32, sublane-padded)
            + tm * th * (4 + cbytes)        # live h (f32 + compute-dtype copy)
        )

    tm = max(SUB, (min(block_rows, _round_up(m, SUB)) // SUB) * SUB)
    while tm > SUB and vmem_needed(tm) > vmem_budget:
        tm = max(SUB, ((tm // 2) // SUB) * SUB)
    # Keep the "parallel" row axis at >= 2 steps so both v7x TensorCores get
    # work (harmless on single-TC v5e/v6e).
    if pl.cdiv(m, tm) < 2 and m > SUB:
        tm = min(tm, _round_up(pl.cdiv(m, 2), SUB))
    return tm, th


def position_wise_ffn(x, w1, b1, w2, b2, *, block_rows=512,
                      compute_dtype=jnp.bfloat16):
    """x: [batch, seq, d_in] -> [batch, seq, d_out].

    w1: [d_in, d_hidden], b1: [d_hidden], w2: [d_hidden, d_out], b2: [d_out]
    (weights stored as [in, out], i.e. transposed vs torch's (out, in) layout).
    """
    orig_dtype = x.dtype
    batch, seq, d_in = x.shape
    d_hidden = w1.shape[1]
    d_out = w2.shape[1]
    m = batch * seq

    # Lane-dense weight/output feature dims (zero padding is exact for
    # matmul + bias + ReLU).  X / d_in are never padded.
    d_hidden_p = _round_up(d_hidden, LANE)
    d_out_p = _round_up(d_out, LANE)

    xbytes = jnp.dtype(orig_dtype).itemsize
    obytes = jnp.dtype(orig_dtype).itemsize
    cbytes = jnp.dtype(compute_dtype).itemsize

    vmem_budget = _vmem_budget_bytes()
    tm, th = _choose_tiles(m, d_in, d_hidden_p, d_out_p, xbytes, obytes,
                           cbytes, block_rows, vmem_budget)
    grid = (pl.cdiv(m, tm), d_hidden_p // th)

    # X: contiguous view only -- no pad, no cast (cast happens in-kernel).
    x2d = x.reshape(m, d_in)
    # Weights: cast once to the MXU compute dtype, pad feature dims to 128.
    w1p = jnp.pad(w1.astype(compute_dtype),
                  ((0, 0), (0, d_hidden_p - d_hidden)))
    w2p = jnp.pad(w2.astype(compute_dtype),
                  ((0, d_hidden_p - d_hidden), (0, d_out_p - d_out)))
    b1p = jnp.pad(b1.astype(jnp.float32).reshape(1, d_hidden),
                  ((0, 0), (0, d_hidden_p - d_hidden)))
    b2p = jnp.pad(b2.astype(jnp.float32).reshape(1, d_out),
                  ((0, 0), (0, d_out_p - d_out)))

    cost = pl.CostEstimate(
        flops=int(2 * m * (d_in * d_hidden_p + d_hidden_p * d_out_p)),
        transcendentals=0,
        bytes_accessed=int(
            m * d_in * xbytes
            + grid[0] * (d_in * d_hidden_p + d_hidden_p * d_out_p) * cbytes
            + (d_hidden_p + d_out_p) * 4
            + m * d_out_p * obytes),
    )

    out2d = pl.pallas_call(
        ffn_kernel,
        out_shape=jax.ShapeDtypeStruct((m, d_out_p), orig_dtype),
        grid_spec=pltpu.PrefetchScalarGridSpec(
            num_scalar_prefetch=0,
            grid=grid,
            in_specs=[
                pl.BlockSpec((tm, d_in), lambda i, j: (i, 0)),       # X row tile
                pl.BlockSpec((d_in, th), lambda i, j: (0, j)),       # w1 chunk
                pl.BlockSpec((1, th), lambda i, j: (0, j)),          # b1 chunk
                pl.BlockSpec((th, d_out_p), lambda i, j: (j, 0)),    # w2 chunk
                pl.BlockSpec((1, d_out_p), lambda i, j: (0, 0)),     # b2
            ],
            out_specs=pl.BlockSpec((tm, d_out_p), lambda i, j: (i, 0)),
            scratch_shapes=[pltpu.VMEM((tm, d_out_p), jnp.float32)],
        ),
        compiler_params=pltpu.CompilerParams(
            dimension_semantics=("parallel", "arbitrary"),
            vmem_limit_bytes=int(vmem_budget),
        ),
        cost_estimate=cost,
    )(x2d, w1p, b1p, w2p, b2p)

    if d_out_p != d_out:
        out2d = out2d[:, :d_out]
    return out2d.reshape(batch, seq, d_out)


def ffn_reference(x, w1, b1, w2, b2, compute_dtype=jnp.float32):
    """Plain-JAX reference mirroring the kernel's dtype choices."""
    xc = x.astype(compute_dtype)
    w1c = w1.astype(compute_dtype)
    w2c = w2.astype(compute_dtype)
    h = jnp.dot(xc, w1c, preferred_element_type=jnp.float32) + b1.astype(jnp.float32)
    h = jnp.maximum(h, 0.0).astype(compute_dtype)
    o = jnp.dot(h, w2c, preferred_element_type=jnp.float32) + b2.astype(jnp.float32)
    return o.astype(x.dtype)


def init_linear_params(key, fan_in, fan_out, dtype=jnp.float32):
    """Deterministic init mimicking torch.nn.Linear: U(-1/sqrt(fan_in), +)."""
    kw, kb = jax.random.split(key)
    bound = 1.0 / (fan_in ** 0.5)
    # stored as [in, out] so the kernel does x @ W directly
    w = jax.random.uniform(kw, (fan_in, fan_out), dtype, -bound, bound)
    b = jax.random.uniform(kb, (fan_out,), dtype, -bound, bound)
    return w, b


if __name__ == "__main__":
    batch, seq = 2, 8
    d_in, d_hidden, d_out = 32, 64, 32   # LazyLinear(64), LazyLinear(32)

    key = jax.random.PRNGKey(0)
    kx, k1, k2 = jax.random.split(key, 3)

    x = jax.random.normal(kx, (batch, seq, d_in), jnp.float32)
    w1, b1 = init_linear_params(k1, d_in, d_hidden)
    w2, b2 = init_linear_params(k2, d_hidden, d_out)

    # 1) Default bf16-MXU path, checked against a bf16-mirrored reference.
    out_bf16 = jax.block_until_ready(position_wise_ffn(x, w1, b1, w2, b2))
    ref_bf16 = ffn_reference(x, w1, b1, w2, b2, jnp.bfloat16)
    assert out_bf16.shape == (batch, seq, d_out)
    assert jnp.allclose(out_bf16, ref_bf16, atol=1e-2, rtol=1e-2)

    # 2) Full-f32 path, checked tightly against the plain-JAX reference.
    out_f32 = jax.block_until_ready(
        position_wise_ffn(x, w1, b1, w2, b2, compute_dtype=jnp.float32))
    ref_f32 = ffn_reference(x, w1, b1, w2, b2, jnp.float32)
    assert jnp.allclose(out_f32, ref_f32, atol=1e-4, rtol=1e-4)

    # 3) Ragged last row tile: M = 18 rows, TM = 16 -> grid (2, 1), no row pad.
    x2 = jax.random.normal(kx, (2, 9, d_in), jnp.float32)
    out2 = jax.block_until_ready(
        position_wise_ffn(x2, w1, b1, w2, b2, block_rows=16))
    ref2 = ffn_reference(x2, w1, b1, w2, b2, jnp.bfloat16)
    assert out2.shape == (2, 9, d_out)
    assert jnp.allclose(out2, ref2, atol=1e-2, rtol=1e-2)

    # 4) Multi-chunk hidden axis (d_hidden=300 -> d_hidden_p=384, 3 chunks of
    #    128) exercising the f32 accumulator init/finalize path, with
    #    non-lane-aligned d_out as well.
    d_in2, d_hidden2, d_out2 = 64, 300, 48
    k3, k4, k5 = jax.random.split(k2, 3)
    x3 = jax.random.normal(k3, (batch, seq, d_in2), jnp.float32)
    w1b, b1b = init_linear_params(k4, d_in2, d_hidden2)
    w2b, b2b = init_linear_params(k5, d_hidden2, d_out2)
    out3 = jax.block_until_ready(
        position_wise_ffn(x3, w1b, b1b, w2b, b2b, compute_dtype=jnp.float32))
    ref3 = ffn_reference(x3, w1b, b1b, w2b, b2b, jnp.float32)
    assert out3.shape == (batch, seq, d_out2)
    assert jnp.allclose(out3, ref3, atol=1e-3, rtol=1e-3)

    out3b = jax.block_until_ready(position_wise_ffn(x3, w1b, b1b, w2b, b2b))
    ref3b = ffn_reference(x3, w1b, b1b, w2b, b2b, jnp.bfloat16)
    assert jnp.allclose(out3b, ref3b, atol=2e-2, rtol=2e-2)

    print("KERNEL_OK")
</pallas_src>

<mosaic_0001>
module attributes {stable_mosaic.version = 11 : i64} {
  func.func @ffn_kernel(%arg0: i32, %arg1: i32, %arg2: memref<8x32xf32, #tpu.memory_space<vmem>>, %arg3: memref<32x128xbf16, #tpu.memory_space<vmem>>, %arg4: memref<1x128xf32, #tpu.memory_space<vmem>>, %arg5: memref<128x128xbf16, #tpu.memory_space<vmem>>, %arg6: memref<1x128xf32, #tpu.memory_space<vmem>>, %arg7: memref<8x128xf32, #tpu.memory_space<vmem>>, %arg8: memref<8x128xf32, #tpu.memory_space<vmem>>) attributes {dimension_semantics = [#tpu.dimension_semantics<parallel>, #tpu.dimension_semantics<arbitrary>], iteration_bounds = array<i64: 2, 1>, scalar_prefetch = 0 : i64, scratch_operands = 1 : i64, tpu.core_type = #tpu.core_type<tc>, window_params = [{transform_indices = @transform_0, window_bounds = array<i64: 8, 32>}, {transform_indices = @transform_1, window_bounds = array<i64: 32, 128>}, {transform_indices = @transform_2, window_bounds = array<i64: 1, 128>}, {transform_indices = @transform_3, window_bounds = array<i64: 128, 128>}, {pipeline_mode = #tpu.pipeline_mode<synchronous>, transform_indices = @transform_4, window_bounds = array<i64: 1, 128>}, {transform_indices = @transform_5, window_bounds = array<i64: 8, 128>}]} {
    %c0_i32 = arith.constant 0 : i32
    %0 = arith.cmpi eq, %arg1, %c0_i32 : i32
    %1 = arith.extui %0 : i1 to i32
    %c0_i32_0 = arith.constant 0 : i32
    %2 = arith.cmpi ne, %1, %c0_i32_0 : i32
    scf.if %2 {
      %cst_16 = arith.constant 0.000000e+00 : f32
      %21 = vector.broadcast %cst_16 : f32 to vector<8x128xf32>
      %c0_17 = arith.constant 0 : index
      %c0_18 = arith.constant 0 : index
      %22 = vector.load %arg8[%c0_17, %c0_18] : memref<8x128xf32, #tpu.memory_space<vmem>>, vector<8x128xf32>
      tpu.vector_store %arg8[%c0_17, %c0_18], %21 {strides = array<i32>} : memref<8x128xf32, #tpu.memory_space<vmem>>, vector<8x128xf32>,
    } else {
    }
    %c0 = arith.constant 0 : index
    %c0_1 = arith.constant 0 : index
    %3 = vector.load %arg2[%c0, %c0_1] : memref<8x32xf32, #tpu.memory_space<vmem>>, vector<8x32xf32>
    %4 = arith.truncf %3 : vector<8x32xf32> to vector<8x32xbf16>
    %c0_2 = arith.constant 0 : index
    %c0_3 = arith.constant 0 : index
    %5 = vector.load %arg3[%c0_2, %c0_3] : memref<32x128xbf16, #tpu.memory_space<vmem>>, vector<32x128xbf16>
    %cst = arith.constant dense<0.000000e+00> : vector<8x128xf32>
    %6 = tpu.matmul %4, %5, %cst {dimension_numbers = #tpu.dot_dimension_numbers<[1], [0], [0], [1], [0, 0, 1, 1], [], []>} : vector<8x32xbf16>, vector<32x128xbf16>, vector<8x128xf32> -> vector<8x128xf32>
    %c0_4 = arith.constant 0 : index
    %c0_5 = arith.constant 0 : index
    %7 = vector.load %arg4[%c0_4, %c0_5] : memref<1x128xf32, #tpu.memory_space<vmem>>, vector<1x128xf32>
    %8 = vector.broadcast %7 : vector<1x128xf32> to vector<8x128xf32>
    %9 = arith.addf %6, %8 : vector<8x128xf32>
    %cst_6 = arith.constant 0.000000e+00 : f32
    %10 = vector.broadcast %cst_6 : f32 to vector<8x128xf32>
    %11 = arith.maximumf %9, %10 : vector<8x128xf32>
    %12 = arith.truncf %11 : vector<8x128xf32> to vector<8x128xbf16>
    %c0_7 = arith.constant 0 : index
    %c0_8 = arith.constant 0 : index
    %13 = vector.load %arg8[%c0_7, %c0_8] : memref<8x128xf32, #tpu.memory_space<vmem>>, vector<8x128xf32>
    %c0_9 = arith.constant 0 : index
    %c0_10 = arith.constant 0 : index
    %14 = vector.load %arg5[%c0_9, %c0_10] : memref<128x128xbf16, #tpu.memory_space<vmem>>, vector<128x128xbf16>
    %cst_11 = arith.constant dense<0.000000e+00> : vector<8x128xf32>
    %15 = tpu.matmul %12, %14, %cst_11 {dimension_numbers = #tpu.dot_dimension_numbers<[1], [0], [0], [1], [0, 0, 1, 1], [], []>} : vector<8x128xbf16>, vector<128x128xbf16>, vector<8x128xf32> -> vector<8x128xf32>
    %16 = arith.addf %13, %15 : vector<8x128xf32>
    %c0_12 = arith.constant 0 : index
    %c0_13 = arith.constant 0 : index
    %17 = vector.load %arg8[%c0_12, %c0_13] : memref<8x128xf32, #tpu.memory_space<vmem>>, vector<8x128xf32>
    tpu.vector_store %arg8[%c0_12, %c0_13], %16 {strides = array<i32>} : memref<8x128xf32, #tpu.memory_space<vmem>>, vector<8x128xf32>,
    %c0_i32_14 = arith.constant 0 : i32
    %18 = arith.cmpi eq, %arg1, %c0_i32_14 : i32
    %19 = arith.extui %18 : i1 to i32
    %c0_i32_15 = arith.constant 0 : i32
    %20 = arith.cmpi ne, %19, %c0_i32_15 : i32
    scf.if %20 {
      %c0_16 = arith.constant 0 : index
      %c0_17 = arith.constant 0 : index
      %21 = vector.load %arg8[%c0_16, %c0_17] : memref<8x128xf32, #tpu.memory_space<vmem>>, vector<8x128xf32>
      %c0_18 = arith.constant 0 : index
      %c0_19 = arith.constant 0 : index
      %22 = vector.load %arg6[%c0_18, %c0_19] : memref<1x128xf32, #tpu.memory_space<vmem>>, vector<1x128xf32>
      %23 = vector.broadcast %22 : vector<1x128xf32> to vector<8x128xf32>
      %24 = arith.addf %21, %23 : vector<8x128xf32>
      %c0_20 = arith.constant 0 : index
      %c0_21 = arith.constant 0 : index
      %25 = vector.load %arg7[%c0_20, %c0_21] : memref<8x128xf32, #tpu.memory_space<vmem>>, vector<8x128xf32>
      tpu.vector_store %arg7[%c0_20, %c0_21], %24 {strides = array<i32>} : memref<8x128xf32, #tpu.memory_space<vmem>>, vector<8x128xf32>,
    } else {
    }
    return
  }
  func.func @transform_0(%arg0: i32, %arg1: i32) -> (i32, i32) {
    %c0_i32 = arith.constant 0 : i32
    %c0_i32_0 = arith.constant 0 : i32
    return %arg0, %c0_i32 : i32, i32
  }
  func.func @transform_1(%arg0: i32, %arg1: i32) -> (i32, i32) {
    %c0_i32 = arith.constant 0 : i32
    %c0_i32_0 = arith.constant 0 : i32
    return %c0_i32, %arg1 : i32, i32
  }
  func.func @transform_2(%arg0: i32, %arg1: i32) -> (i32, i32) {
    %c0_i32 = arith.constant 0 : i32
    %c0_i32_0 = arith.constant 0 : i32
    return %c0_i32, %arg1 : i32, i32
  }
  func.func @transform_3(%arg0: i32, %arg1: i32) -> (i32, i32) {
    %c0_i32 = arith.constant 0 : i32
    %c0_i32_0 = arith.constant 0 : i32
    return %arg1, %c0_i32 : i32, i32
  }
  func.func @transform_4(%arg0: i32, %arg1: i32) -> (i32, i32) {
    %c0_i32 = arith.constant 0 : i32
    %c0_i32_0 = arith.constant 0 : i32
    %c0_i32_1 = arith.constant 0 : i32
    return %c0_i32, %c0_i32_0 : i32, i32
  }
  func.func @transform_5(%arg0: i32, %arg1: i32) -> (i32, i32) {
    %c0_i32 = arith.constant 0 : i32
    %c0_i32_0 = arith.constant 0 : i32
    return %arg0, %c0_i32 : i32, i32
  }
}

</mosaic_0001>

<bundles_post_ra>
// kernel: tpu_custom_call.1
= control target key start
LH: loop header
LB: loop body
LE: loop exit
PB: predicated region body
PF: predicated region fallthrough
CT: control target
= control target key end

     0   :  { %10 = vsyncpa [#allocation4], 0  ;;  %s1275_s0 = inlined_call_operand.hbm [shape: f32[16,32], index: 0, kind: input, shape index: {}]   ;;  %s1276_s1 = inlined_call_operand.hbm [shape: bf16[32,128], index: 1, kind: input, shape index: {}]   ;;  %s1277_s2 = inlined_call_operand.vmem [shape: f32[1,128], index: 2, kind: input, shape index: {}]   ;;  %s1278_s3 = inlined_call_operand.hbm [shape: bf16[128,128], index: 3, kind: input, shape index: {}]   ;;  %s1279_s4 = inlined_call_operand.vmem [shape: f32[1,128], index: 4, kind: input, shape index: {}]   ;;  %s1280_s5 = inlined_call_operand.hbm [shape: f32[16,128], index: 5, kind: output, shape index: {}]  }
   0x1   :  { %12 = vsyncpa [#allocation4 + $0x1], 0 }
   0x2   :  { %13 = vsyncpa [#allocation7], 0 }
   0x3   :  { %14 = vsyncpa [#allocation5], 0 }
   0x4   :  { %16 = vsyncpa [#allocation5 + $0x1], 0  ;;  %s1015_s18 = smov 0   ;;  %s1017_s19 = smov 0  }
   0x5   :  { %s1019_s20 = smov 0   ;;  %s1021_s21 = smov 0  }
   0x6   :  { %s1023_s22 = smov 0   ;;  %s1025_s23 = smov 0  }
   0x7 LB: > { %s635_s24 = sadd.s32 4294967295, %s975_s23   ;;  %s636_s25 = sadd.s32 4294967294, %s975_s23   ;;  %s975_s23 = sphi %s1025_s23, %s22_s23   ;;  %s971_s22 = sphi %s1023_s22, %s1302_s22   ;;  %s967_s21 = sphi %s1021_s21, %s1301_s21   ;;  %s963_s20 = sphi %s1019_s20, %s1300_s20   ;;  %s959_s19 = sphi %s1017_s19, %s1299_s19   ;;  %s955_s18 = sphi %s1015_s18, %s1298_s18  }
   0x8   : > { %p54_p0 = scmp.ne.s32.totalorder %s959_s19, %s955_s18  ;;  %p1049_p1 = scmp.eq.s32.totalorder %s635_s24, 0 }
   0x9   : > { %p1053_p2 = scmp.eq.s32.totalorder %s635_s24, 1  ;;  %p183_p3 = scmp.eq.s32.totalorder %s636_s25, 1 }
   0xa   : > { %s1285_s26 = scalar_select %p1049_p1, 1, 0 }
   0xb   : > { %p1059_p4 = por %p1049_p1, %p54_p0  ;;  %p637_p5 = scmp.ge.s32.totalorder %s975_s23, 1 }
   0xc   : > { %p1064_p6 = por %p183_p3, %p54_p0  ;;  %p190_p7 = scmp.lt.s32.totalorder %s975_s23, 3 }
   0xd   : > { %s1287_s28 = scalar_select %p1059_p4, 1, 0 }
   0xe   : > { %s1288_s29 = scalar_select %p1064_p6, 1, 0 }
   0xf   : > { %p1069_p8 = pnand %p637_p5, %p190_p7  ;;  %s977_s6 = smov [#allocation6]  }
  0x10   : > { %s204_s7 = sshll.u32 %s977_s6, 4  ;;  %s978_s9 = smov [#allocation8]   ;;  %s1073_s7 = int_to_ptr.vmem [resolvable:$true] %s204_s7 }
  0x11   : > { %p718_p9 = pneg %p1069_p8  ;;  %s226_s10 = sshll.u32 %s978_s9, 4  ;;  %s1084_s10 = int_to_ptr.vmem [resolvable:$true] %s226_s10 }
  0x12   : > { %s803_s13 = scalar_lea.hbm %s1276_s1, 256 }
  0x13   : > { %p1080_p11 = pnand %p718_p9, %p1049_p1  ;;  %p804_p12 = scmp.ne.s32.totalorder %s1276_s1, %s803_s13 }
  0x14   : > { %p810_p5 = scmp.lt.u32.totalorder %s803_s13, %s1276_s1 }
  0x15   : > { %p805_p13 = pneg %p1080_p11 }
  0x17   : > { %p806_p0 = pnand %p805_p13, %p804_p12 }
  0x19   : > { %p807_p3 = pneg %p806_p0 }
  0x1b   : > { %p812_p7 = pnand %p810_p5, %p807_p3 }
  0x1d   : > { %815 = shalt.err (!%p812_p7)
}
  0x1e   : > { %s816_s24 = scalar_lea.vmem %s1073_s7, 256  ;;  %p824_p1 = scmp.lt.s32.totalorder %s1073_s7, %s1073_s7 }
  0x1f   : > { %p817_p9 = scmp.ne.s32.totalorder %s1073_s7, %s816_s24  ;;  %p825_p12 = scmp.lt.s32.totalorder %s816_s24, %s816_s24 }
  0x21   : > { %p819_p10 = pnand %p817_p9, %p805_p13  ;;  %p826_p0 = por %p825_p12, %p824_p1 }
  0x23   : > { %p820_p6 = pneg %p819_p10 }
  0x25   : > { %p827_p4 = pnand %p826_p0, %p820_p6 }
  0x27   : > { %830 = shalt.err (!%p827_p4)
}
  0x28   : > { %s979_s25 = smov 64   ;;  %s980_s6 = smov 4  }
  0x29   : > { %721 = dma.hbm_to_vmem [thread:$0]  (!%p1080_p11), %s1276_s1, 256, %s1073_s7, [#allocation7], %s979_s25, %s979_s25, %s980_s6  }
  0x2a   : > { %s831_s14 = scalar_lea.hbm %s1278_s3, 1024 }
  0x2b   : > { %p832_p1 = scmp.ne.s32.totalorder %s1278_s3, %s831_s14  ;;  %p838_p10 = scmp.lt.u32.totalorder %s831_s14, %s1278_s3 }
  0x2d   : > { %p834_p4 = pnand %p832_p1, %p805_p13 }
  0x2f   : > { %p835_p6 = pneg %p834_p4 }
  0x31   : > { %p840_p3 = pnand %p838_p10, %p835_p6 }
  0x33   : > { %843 = shalt.err (!%p840_p3)
}
  0x34   : > { %s844_s7 = scalar_lea.vmem %s1084_s10, 1024  ;;  %p852_p12 = scmp.lt.s32.totalorder %s1084_s10, %s1084_s10 }
  0x35   : > { %p845_p5 = scmp.ne.s32.totalorder %s1084_s10, %s844_s7  ;;  %p853_p0 = scmp.lt.s32.totalorder %s844_s7, %s844_s7 }
  0x37   : > { %p847_p7 = pnand %p845_p5, %p805_p13  ;;  %p854_p1 = por %p853_p0, %p852_p12 }
  0x39   : > { %p848_p9 = pneg %p847_p7 }
  0x3b   : > { %p855_p4 = pnand %p854_p1, %p848_p9 }
  0x3d   : > { %858 = shalt.err (!%p855_p4)
}
  0x3e   : > { %724 = dma.hbm_to_vmem [thread:$0]  (!%p1080_p11), %s1278_s3, 1024, %s1084_s10, [#allocation7], %s979_s25, %s979_s25, %s980_s6  }
  0x3f   : > { %s34_s12 = sadd.s32 1, %s971_s22  ;;  %s41_s13 = sadd.s32 1, %s963_s20 }
  0x40   : > { %p36_p13 = scmp.ge.s32.totalorder %s34_s12, 2  ;;  %p48_p6 = scmp.ne.s32.totalorder %s963_s20, %s959_s19 }
  0x41   : > { %p49_p10 = scmp.eq.s32.totalorder %s975_s23, 0  ;;  %p735_p3 = scmp.lt.s32.totalorder %s975_s23, 2 }
  0x42   : > { %s1304_s12 = smov (%p36_p13, %s34_s12), 0  ;;  %p1148_p7 = por %p1053_p2, %p48_p6 }
  0x43   : > { %p50_p5 = por %p49_p10, %p48_p6  ;;  %s38_s14 = ssub.s32 %s971_s22, %s1304_s12 }
  0x44   : > { %s1291_s8 = scalar_select %p1148_p7, 1, 0 }
  0x45   : > { %s243_s15 = sand.u32 1, %s963_s20   ;;  %p39_p9 = scmp.eq.s32.totalorder %s38_s14, 0 }
  0x46   : > { %s642_s10 = sshll.u32 %s243_s15, 3  ;;  %s643_s25 = sshll.u32 %s971_s22, 7 }
  0x47   : > { %s1157_s6 = scalar_select %p39_p9, %s963_s20, %s41_s13  }
  0x48   : > { %s1162_s24 = scalar_lea.hbm %s1275_s0, %s643_s25  ;;  %s247_s27 = scalar_lea.vmem [#allocation3], %s642_s10 }
  0x49   : > { %s254_s7 = sshll.u32 %s247_s27, 4  ;;  %p1166_p2 = pnand %p735_p3, %p50_p5  ;;  %s1170_s7 = int_to_ptr.vmem [resolvable:$true] %s254_s7 }
  0x4a   : > { %s244_s11 = scalar_lea.sflag [#allocation4], %s243_s15  ;;  %s859_s13 = scalar_lea.hbm %s1162_s24, 128 }
  0x4b   : > { %p860_p11 = scmp.ne.s32.totalorder %s1162_s24, %s859_s13  ;;  %p861_p12 = pneg %p1166_p2 }
  0x4c   : > { %s864_s25 = scalar_lea.hbm %s1275_s0, 256  ;;  %p865_p4 = scmp.lt.u32.totalorder %s1162_s24, %s1275_s0 }
  0x4d   : > { %p862_p0 = pnand %p861_p12, %p860_p11  ;;  %p866_p13 = scmp.lt.u32.totalorder %s864_s25, %s859_s13 }
  0x4e   : > { %p868_p10 = scmp.lt.u32.totalorder %s859_s13, %s1162_s24 }
  0x4f   : > { %p863_p1 = pneg %p862_p0  ;;  %p867_p6 = por %p866_p13, %p865_p4 }
  0x51   : > { %p869_p3 = por %p868_p10, %p867_p6 }
  0x53   : > { %p870_p5 = pnand %p869_p3, %p863_p1 }
  0x55   : > { %873 = shalt.err (!%p870_p5)
}
  0x56   : > { %s874_s15 = scalar_lea.vmem %s1170_s7, 128  ;;  %s981_s27 = smov [#allocation3]  }
  0x57   : > { %p875_p9 = scmp.ne.s32.totalorder %s1170_s7, %s874_s15  ;;  %s879_s14 = sshll.u32 %s981_s27, 4  ;;  %s880_s14 = int_to_ptr.vmem [resolvable:$false] %s879_s14 }
  0x58   : > { %s881_s10 = scalar_lea.vmem %s880_s14, 256  ;;  %p882_p7 = scmp.lt.s32.totalorder %s1170_s7, %s880_s14 }
  0x59   : > { %p877_p11 = pnand %p875_p9, %p861_p12  ;;  %p883_p4 = scmp.lt.s32.totalorder %s881_s10, %s874_s15 }
  0x5b   : > { %p878_p0 = pneg %p877_p11  ;;  %p884_p13 = por %p883_p4, %p882_p7 }
  0x5d   : > { %p885_p6 = pnand %p884_p13, %p878_p0 }
  0x5f   : > { %888 = shalt.err (!%p885_p6)
}
  0x60   : > { %728 = dma.hbm_to_vmem [thread:$0]  (!%p1166_p2), %s1162_s24, 128, %s1170_s7, %s244_s11  }
  0x61   : > { %263 = sbr.rel (%p1069_p8) target bundleno = 564 (0x234), region = 40  ;;  %s1200_s13 = sand.u32 (!%p1069_p8), 1, %s959_s19  }
  0x62   : > { %s645_s25 = sshll.u32 (!%p1069_p8), %s1200_s13, 3  ;;  %s266_s16 = scalar_lea.sflag (!%p1069_p8), [#allocation4], %s1200_s13 }
  0x63   : > { %s269_s17 = scalar_lea.vmem (!%p1069_p8), [#allocation3], %s645_s25  ;;  %p1293_p7 = scmp.ne.s32.totalorder (!%p1069_p8), %s1287_s28, 0 }
  0x68   : > { %942 = dma.done.wait (%p1293_p7), %s266_s16, 128  }
  0x69   : > { %944 = vsyncadd (%p1293_p7), %s266_s16, 4294967168  ;;  %p1294_p2 = scmp.ne.s32.totalorder %s1285_s26, 0 }
  0x6b   : > { %946 = dma.done.wait (%p1294_p2), [#allocation7], 1280  }
  0x6c   : > { %948 = vsyncadd (%p1294_p2), [#allocation7], 4294966016  ;;  %v982_v0 = vmov 0.0   ;;  %vm983_vm0 = vmmov 0   ;;  %v793_v1 = vld [vmem:[#allocation6] sm:$0xff]   ;;  %v794_v2 = vld [vmem:[#allocation6 + $0x8] sm:$0xff]  }
  0x6d   : > { %678 = vmatprep.subr.bf16.mxu0 %v982_v0  ;;  %682 = vmatprep.mubr.msk.bf16.mxu0 %vm983_vm0, %v982_v0  ;;  %v317_v3 = vld [vmem:[%s269_s17] sm:$0xff]  ;;  %vm342_vm1 = vcmask 261120   ;;  %v797_v7 = vld [vmem:[#allocation8 + $0x10] sm:$0xff]   ;;  %v798_v8 = vld [vmem:[#allocation8 + $0x18] sm:$0xff]   ;;  %s663_s7 = sshll.u32 %s967_s21, 7  ;;  %s306_s9 = scalar_lea.vmem [#allocation9], %s645_s25 }
  0x6e   : > { %686 = vmatprep.subr.bf16.mxu1 %v982_v0  ;;  %702 = vmatprep.mubr.msk.bf16.mxu1 %vm983_vm0, %v982_v0  ;;  %v795_v4 = vld [vmem:[#allocation8] sm:$0xff]   ;;  %v318_v5 = vpack.c.bf16 %v317_v3, %v317_v3  ;;  %v796_v6 = vld [vmem:[#allocation8 + $0x8] sm:$0xff]   ;;  %v801_v11 = vld [vmem:[#allocation8 + $0x30] sm:$0xff]   ;;  %s522_s11 = sshll.u32 %s306_s9, 4  ;;  %s1226_s14 = scalar_lea.hbm %s1280_s5, %s663_s7  ;;  %s1228_s11 = int_to_ptr.vmem [resolvable:$true] %s522_s11 }
  0x6f   : > { %679 = vmatpush3.bf16.msra.mxu0 %v793_v1  ;;  %687 = vmatpush3.bf16.msra.mxu1 %v795_v4  ;;  %v799_v9 = vld [vmem:[#allocation8 + $0x20] sm:$0xff]   ;;  %v800_v10 = vld [vmem:[#allocation8 + $0x28] sm:$0xff]   ;;  %v802_v12 = vld [vmem:[#allocation8 + $0x38] sm:$0xff]   ;;  %s509_s21 = scalar_lea.sflag [#allocation5], %s1200_s13  ;;  %s889_s10 = scalar_lea.vmem %s1228_s11, 128 }
  0x70   : > { %680 = vmatprep.subr.bf16.mxu0 %v982_v0  ;;  %688 = vmatprep.subr.bf16.mxu1 %v982_v0  ;;  %v649_v13 = vld [vmem:[%s1277_s2] ss:$0 sm:$0xff]  ;;  %p890_p8 = scmp.ne.s32.totalorder %s1228_s11, %s889_s10  ;;  %p1295_p12 = scmp.ne.s32.totalorder %s1291_s8, 0 }
  0x71   : > { %v661_v21 = vld [vmem:[%s1279_s4] ss:$0 sm:$0xff]  ;;  %s984_s25 = smov [#allocation9]  }
  0x72   : > { %p891_p1 = pnand %p890_p8, %p1295_p12  ;;  %s893_s16 = sshll.u32 %s984_s25, 4  ;;  %s894_s16 = int_to_ptr.vmem [resolvable:$false] %s893_s16 }
  0x73   : > { %681 = vmatpush3.bf16.msra.mxu0 %v794_v2  ;;  %689 = vmatpush3.bf16.msra.mxu1 %v796_v6  ;;  %s895_s17 = scalar_lea.vmem %s894_s16, 256  ;;  %p896_p3 = scmp.lt.s32.totalorder %s1228_s11, %s894_s16 }
  0x74   : > { %690 = vmatprep.subr.bf16.mxu1 %v982_v0  ;;  %p892_p10 = pneg %p891_p1  ;;  %p897_p5 = scmp.lt.s32.totalorder %s895_s17, %s889_s10 }
  0x76   : > { %683 = vmatmul.mubr.msk.bf16.vlgmr.msra.gmra.mrb[0].mxu0 %vm342_vm1, %v318_v5  ;;  %p898_p9 = por %p897_p5, %p896_p3 }
  0x77   : > { %691 = vmatpush3.bf16.msra.mxu1 %v797_v7 }
  0x78   : > { %692 = vmatprep.subr.bf16.mxu1 %v982_v0  ;;  %p899_p11 = pnand %p898_p9, %p892_p10 }
  0x7b   : > { %693 = vmatpush3.bf16.msra.mxu1 %v798_v8 }
  0x7c   : > { %694 = vmatprep.subr.bf16.mxu1 %v982_v0 }
  0x7f   : > { %695 = vmatpush3.bf16.msra.mxu1 %v799_v9 }
  0x80   : > { %696 = vmatprep.subr.bf16.mxu1 %v982_v0 }
  0x83   : > { %697 = vmatpush3.bf16.msra.mxu1 %v800_v10 }
  0x84   : > { %698 = vmatprep.subr.bf16.mxu1 %v982_v0 }
  0x87   : > { %699 = vmatpush3.bf16.msra.mxu1 %v801_v11 }
  0x88   : > { %700 = vmatprep.subr.bf16.mxu1 %v982_v0 }
  0x8b   : > { %701 = vmatpush3.bf16.msra.mxu1 %v802_v12 }
 0x149   : > { %v380_v14 = vpop.f32.mrb[0].mxu0 }
 0x14a   : > { %v381_v15 = vadd.f32 %v649_v13, %v380_v14  ;;  %v684_v16 = vpop.f32.mrb[1].mxu0 }
 0x14b   : > { %v383_v17 = vpop.f32.mrb[2].mxu0 }
 0x14c   : > { %v386_v18 = vmax.f32 %v381_v15, 0.0  ;;  %v685_v19 = vpop.f32.mrb[3].mxu0 }
 0x14e   : > { %v387_v20 = vpack.c.bf16 %v386_v18, %v386_v18 }
 0x150   : > { %703 = vmatmul.mubr.bf16.vlgmr.msra.gmra.mrb[0].mxu1 %v387_v20 }
 0x223   : > { %v487_v22 = vpop.f32.mrb[0].mxu1 }
 0x224   : > { %v506_v23 = vadd.f32 %v661_v21, %v487_v22  ;;  %v704_v24 = vpop.f32.mrb[1].mxu1 }
 0x225   : > { %v490_v25 = vpop.f32.mrb[2].mxu1 }
 0x226   : > { %507 = vst [vmem:[%s306_s9] sm:$0xff] %v506_v23  ;;  %v705_v26 = vpop.f32.mrb[3].mxu1 }
 0x227   : > { %902 = shalt.err (!%p899_p11)
}
 0x228   : > { %s903_s13 = scalar_lea.hbm %s1226_s14, 128  ;;  %s907_s30 = scalar_lea.hbm %s1280_s5, 256 }
 0x229   : > { %p904_p0 = scmp.ne.s32.totalorder %s1226_s14, %s903_s13  ;;  %p908_p6 = scmp.lt.u32.totalorder %s1226_s14, %s1280_s5 }
 0x22a   : > { %p909_p7 = scmp.lt.u32.totalorder %s907_s30, %s903_s13  ;;  %p911_p8 = scmp.lt.u32.totalorder %s903_s13, %s1226_s14 }
 0x22b   : > { %p905_p4 = pnand %p904_p0, %p1295_p12 }
 0x22c   : > { %p910_p2 = por %p909_p7, %p908_p6 }
 0x22d   : > { %p906_p13 = pneg %p905_p4 }
 0x22e   : > { %p912_p1 = por %p911_p8, %p910_p2 }
 0x230   : > { %p913_p10 = pnand %p912_p1, %p906_p13 }
 0x232   : > { %916 = shalt.err (!%p913_p10)
}
 0x233   : > { %716 = dma.vmem_to_hbm [thread:$0]  (%p1295_p12), %s1228_s11, 128, %s1226_s14, %s509_s21  }
 0x234 PF: > { %s534_s9 = sand.u32 1, %s955_s18   ;;  %p1296_p3 = scmp.ne.s32.totalorder %s1288_s29, 0 }
 0x235   : > { %p1297_p5 = scmp.ge.s32.totalorder %s975_s23, 2  ;;  %s535_s15 = scalar_lea.sflag [#allocation5], %s534_s9 }
 0x237   : > { %p730_p9 = pnand %p1297_p5, %p1296_p3 }
 0x239   : > { %950 = dma.done.wait (!%p730_p9), %s535_s15, 128  }
 0x23a   : > { %952 = vsyncadd (!%p730_p9), %s535_s15, 4294967168  ;;  %s22_s23 = sadd.s32 1, %s975_s23   ;;  %s1298_s18 = smov %s959_s19 }
 0x23b   : > { %p19_p11 = scmp.ge.s32.totalorder %s22_s23, 4   ;;  %s1299_s19 = smov %s963_s20 }
 0x23c   : > { %s1300_s20 = smov %s1157_s6  ;;  %s1301_s21 = smov %s971_s22 }
 0x23d   : > { %s1302_s22 = smov %s1304_s12  ;;  %21 = sbr.rel (!%p19_p11) target bundleno = 7 (0x7), region = 106 }
 0x244   :  { %540 = vsyncpa [#allocation4], 1 }
 0x245   :  { %542 = vsyncpa [#allocation4 + $0x1], 1 }
 0x246   :  { %543 = vsyncpa [#allocation7], 1 }
 0x247   :  { %544 = vsyncpa [#allocation5], 1 }
 0x248   :  { %546 = vsyncpa [#allocation5 + $0x1], 1 }

</bundles_post_ra>
